<compile_context>
chip_gen: v6e
topology: v6e:2x2x1
jax: 0.10.0
libtpu: 0.0.40
codegen_flags: <defaults>
</compile_context>

<pallas_src>
import numpy as np

import jax
import jax.numpy as jnp
from jax.experimental import pallas as pl
from jax.experimental.pallas import tpu as pltpu


def _conv_block_kernel(x_ref, wk_ref, shift_ref, alpha_ref, o_ref):
    """Fused conv(3x3, s1, p1) + BN(eval) + PReLU for one batch tile.

    x_ref:     (B, Hp, Wp*Cin)        lane-packed, pre-padded activations
    wk_ref:    (KH*Wp*Cin, W*Cout)    banded conv weight, BN scale folded in
    shift_ref: (1, W*Cout)            per-lane shift (conv bias + BN offset, W-tiled)
    alpha_ref: (1,) in SMEM           shared PReLU slope
    o_ref:     (B, H, W*Cout)         lane-dense output
    """
    B, H, WCo = o_ref.shape
    WpC = x_ref.shape[2]
    KH = wk_ref.shape[0] // WpC

    # Stage the KH sublane-shifted views once and fuse the KH matmuls into a single
    # MXU contraction with K = KH*Wp*Cin (216 here): 3x fewer MXU pushes and no
    # per-kh accumulator round trips.
    lhs = jnp.concatenate(
        [x_ref[:, kh:kh + H, :].reshape(B * H, WpC) for kh in range(KH)], axis=-1)
    acc = jnp.dot(lhs, wk_ref[...], preferred_element_type=jnp.float32)

    # Epilogue in f32 (v5e has no bf16 VPU path): + fused bias/BN shift, then PReLU.
    y = acc + shift_ref[...]
    alpha = alpha_ref[0]
    y = jnp.where(y >= 0.0, y, alpha * y)
    o_ref[...] = y.reshape(B, H, WCo).astype(o_ref.dtype)


def _num_tensorcores():
    """Best-effort TensorCores-per-chip (v7x = 2, v5e/v6e = 1)."""
    try:
        kind = jax.devices()[0].device_kind.lower()
    except Exception:
        return 1
    return 2 if "v7" in kind else 1


def _vmem_capacity_bytes():
    try:
        return int(pltpu.get_tpu_info().vmem_capacity_bytes)
    except Exception:
        return 64 * 1024 * 1024   # v7x per-TC VMEM (smallest of the three gens)


def conv_block_forward(x_nchw, params, *, eps=1e-5,
                       compute_dtype=jnp.bfloat16, out_dtype=jnp.float32,
                       batch_tile=None):
    """Forward pass of ConvBlock. x_nchw: (N, Cin, H, W) float32 -> (N, Cout, H, W)."""
    w_oihw = params["conv_w"]          # (Cout, Cin, KH, KW)
    conv_b = params["conv_b"]          # (Cout,)
    gamma = params["bn_gamma"]         # (Cout,)
    beta = params["bn_beta"]           # (Cout,)
    mean = params["bn_mean"]           # (Cout,)
    var = params["bn_var"]             # (Cout,)
    alpha = params["prelu_alpha"]      # scalar

    N, Cin, H, W = x_nchw.shape
    Cout, _, KH, KW = w_oihw.shape
    ph, pw = (KH - 1) // 2, (KW - 1) // 2
    # TODO(synk): even kernel sizes would need PyTorch's asymmetric padding handling.
    Hp, Wp = H + 2 * ph, W + 2 * pw

    dsize = jnp.dtype(compute_dtype).itemsize
    osize = jnp.dtype(out_dtype).itemsize

    # ---- generation-aware batch tiling ------------------------------------------
    if batch_tile is None:
        if _num_tensorcores() >= 2 and N >= 2:
            # v7x: largest tile that still leaves >= 2 grid steps for 2-TC sharding.
            batch_tile = max(d for d in range(1, N // 2 + 1) if N % d == 0)
        else:
            # v5e / v6e: one grid step — avoids ~0.35 us/step overhead, maximizes M.
            batch_tile = N
    assert N % batch_tile == 0
    grid = (N // batch_tile,)

    # ---- one-time constant folding / layout prep (outside the hot kernel) -------
    scale = gamma / jnp.sqrt(var + eps)                        # (Cout,)
    shift = beta + scale * (conv_b - mean)                     # (Cout,)
    # BN scale folded into the weights in f32, THEN cast to compute_dtype.
    w_hwio = jnp.transpose(w_oihw, (2, 3, 1, 0)) * scale       # (KH,KW,Cin,Cout)

    # Banded weight: Wk[kh, wp*Cin+ci, w*Cout+co] = w_hwio[kh, wp-w, ci, co] when
    # 0 <= wp - w < KW, else 0.  Built once; turns the (kw, ci) conv taps into a
    # single lane-dense K dimension.
    sel = np.zeros((KW, Wp, W), np.float32)
    for kw in range(KW):
        sel[kw, kw:kw + W, :] += np.eye(W, dtype=np.float32)
    wk = jnp.einsum("kpw,hkio->hpiwo", jnp.asarray(sel), w_hwio)   # (KH,Wp,Cin,W,Cout)
    wk = wk.reshape(KH * Wp * Cin, W * Cout).astype(compute_dtype)

    # Lane-packed, pre-padded activations: (N, Hp, Wp*Cin).
    x_nhwc = jnp.transpose(x_nchw, (0, 2, 3, 1))
    x_pad = jnp.pad(x_nhwc, ((0, 0), (ph, ph), (pw, pw), (0, 0)))
    x_packed = x_pad.reshape(N, Hp, Wp * Cin).astype(compute_dtype)

    # Per-lane shift matching the (w, co) lane packing of the output; kept f32.
    shift_lane = jnp.tile(shift.astype(jnp.float32), W).reshape(1, W * Cout)
    alpha_smem = jnp.asarray(alpha, jnp.float32).reshape(1)

    # ---- VMEM budget -------------------------------------------------------------
    WpC, WCo = Wp * Cin, W * Cout
    vmem_cap = _vmem_capacity_bytes()
    wk_bytes = KH * WpC * WCo * dsize
    if wk_bytes > vmem_cap // 4:
        # TODO(synk): add a W/Cout grid axis with a KW-1 halo or im2col fallback.
        raise NotImplementedError(
            f"banded weight ({wk_bytes} B) exceeds 1/4 of VMEM ({vmem_cap} B)")
    required = (
        2 * batch_tile * Hp * WpC * dsize          # double-buffered x tile
        + 2 * wk_bytes                             # wk (constant index; conservative)
        + 2 * WCo * 4                              # shift
        + 2 * batch_tile * H * WCo * osize         # double-buffered out tile
        + batch_tile * H * KH * WpC * dsize        # staged LHS
        + batch_tile * H * WCo * 4                 # f32 accumulator
    )
    vmem_limit = int(min(vmem_cap, max(2 * required, 32 * 1024 * 1024)))

    cost = pl.CostEstimate(
        flops=2 * N * H * (KH * WpC) * WCo,
        transcendentals=0,
        bytes_accessed=(x_packed.size * dsize + wk_bytes
                        + WCo * 4 + N * H * WCo * osize),
    )

    out_packed = pl.pallas_call(
        _conv_block_kernel,
        out_shape=jax.ShapeDtypeStruct((N, H, WCo), out_dtype),
        grid_spec=pltpu.PrefetchScalarGridSpec(
            num_scalar_prefetch=0,
            grid=grid,
            in_specs=[
                pl.BlockSpec((batch_tile, Hp, WpC), lambda n: (n, 0, 0)),
                pl.BlockSpec((KH * WpC, WCo), lambda n: (0, 0)),
                pl.BlockSpec((1, WCo), lambda n: (0, 0)),
                pl.BlockSpec(memory_space=pltpu.MemorySpace.SMEM),   # PReLU slope
            ],
            out_specs=pl.BlockSpec((batch_tile, H, WCo), lambda n: (n, 0, 0)),
        ),
        compiler_params=pltpu.CompilerParams(
            dimension_semantics=("parallel",),
            vmem_limit_bytes=vmem_limit,
        ),
        cost_estimate=cost,
    )(x_packed, wk, shift_lane, alpha_smem)

    # Unpack lanes and return in PyTorch's NCHW convention.
    # TODO(synk): skip this transpose when chaining ConvBlocks (keep packed layout).
    out_nhwc = out_packed.reshape(N, H, W, Cout)
    return jnp.transpose(out_nhwc, (0, 3, 1, 2))


def _reference_forward(x_nchw, params, eps=1e-5):
    """Pure-JAX reference for a correctness check."""
    w = params["conv_w"]
    y = jax.lax.conv_general_dilated(
        x_nchw, w, window_strides=(1, 1), padding=((1, 1), (1, 1)),
        dimension_numbers=("NCHW", "OIHW", "NCHW"))
    y = y + params["conv_b"][None, :, None, None]
    scale = params["bn_gamma"] / jnp.sqrt(params["bn_var"] + eps)
    y = (y - params["bn_mean"][None, :, None, None]) * scale[None, :, None, None] \
        + params["bn_beta"][None, :, None, None]
    a = params["prelu_alpha"]
    return jnp.where(y >= 0, y, a * y)


def init_params(key, in_channels, out_channels, kernel_size=(3, 3)):
    kw, kb, kg, kbt, km, kv = jax.random.split(key, 6)
    KH, KW = kernel_size
    fan_in = in_channels * KH * KW
    bound = 1.0 / jnp.sqrt(fan_in)
    return {
        "conv_w": jax.random.uniform(
            kw, (out_channels, in_channels, KH, KW),
            minval=-bound, maxval=bound, dtype=jnp.float32),
        "conv_b": jax.random.uniform(
            kb, (out_channels,), minval=-bound, maxval=bound, dtype=jnp.float32),
        "bn_gamma": 1.0 + 0.1 * jax.random.normal(kg, (out_channels,), jnp.float32),
        "bn_beta": 0.1 * jax.random.normal(kbt, (out_channels,), jnp.float32),
        "bn_mean": 0.1 * jax.random.normal(km, (out_channels,), jnp.float32),
        "bn_var": jnp.abs(1.0 + 0.1 * jax.random.normal(kv, (out_channels,),
                                                        jnp.float32)),
        "prelu_alpha": jnp.float32(0.25),   # nn.PReLU() default init
    }


if __name__ == "__main__":
    key = jax.random.PRNGKey(0)
    kx, kp = jax.random.split(key)

    N, Cin, Cout, H, W = 2, 4, 8, 16, 16
    x = jax.random.normal(kx, (N, Cin, H, W), jnp.float32)
    params = init_params(kp, Cin, Cout)

    ref = jax.block_until_ready(_reference_forward(x, params))

    # Default path: bf16 operands, f32 MXU accumulation + f32 epilogue, f32 output.
    out = jax.block_until_ready(conv_block_forward(x, params))
    assert out.shape == (N, Cout, H, W)
    assert float(jnp.max(jnp.abs(out - ref))) < 5e-2, "bf16 mismatch vs reference"

    # Full-precision path (activations + weights in f32).
    out_f32 = jax.block_until_ready(
        conv_block_forward(x, params, compute_dtype=jnp.float32))
    assert out_f32.shape == (N, Cout, H, W)
    assert jnp.allclose(out_f32, ref, atol=1e-4, rtol=1e-4), "f32 mismatch vs reference"

    print("KERNEL_OK")
</pallas_src>

<mosaic_0001>
module attributes {stable_mosaic.version = 11 : i64} {
  func.func @_conv_block_kernel(%arg0: i32, %arg1: memref<2x18x72xbf16, #tpu.memory_space<vmem>>, %arg2: memref<216x128xbf16, #tpu.memory_space<vmem>>, %arg3: memref<1x128xf32, #tpu.memory_space<vmem>>, %arg4: memref<1xf32, #tpu.memory_space<smem>>, %arg5: memref<2x16x128xf32, #tpu.memory_space<vmem>>) attributes {dimension_semantics = [#tpu.dimension_semantics<parallel>], iteration_bounds = array<i64: 1>, scalar_prefetch = 0 : i64, scratch_operands = 0 : i64, tpu.core_type = #tpu.core_type<tc>, window_params = [{transform_indices = @transform_0, window_bounds = array<i64: 2, 18, 72>}, {pipeline_mode = #tpu.pipeline_mode<synchronous>, transform_indices = @transform_1, window_bounds = array<i64: 216, 128>}, {pipeline_mode = #tpu.pipeline_mode<synchronous>, transform_indices = @transform_2, window_bounds = array<i64: 1, 128>}, {transform_indices = @transform_3, window_bounds = array<i64: 1>}, {transform_indices = @transform_4, window_bounds = array<i64: 2, 16, 128>}]} {
    %c0 = arith.constant 0 : index
    %c0_0 = arith.constant 0 : index
    %c0_1 = arith.constant 0 : index
    %0 = vector.load %arg1[%c0, %c0_0, %c0_1] : memref<2x18x72xbf16, #tpu.memory_space<vmem>>, vector<2x16x72xbf16>
    %1 = vector.shape_cast %0 : vector<2x16x72xbf16> to vector<32x72xbf16>
    %c0_2 = arith.constant 0 : index
    %c1 = arith.constant 1 : index
    %c0_3 = arith.constant 0 : index
    %2 = vector.load %arg1[%c0_2, %c1, %c0_3] : memref<2x18x72xbf16, #tpu.memory_space<vmem>>, vector<2x16x72xbf16>
    %3 = vector.shape_cast %2 : vector<2x16x72xbf16> to vector<32x72xbf16>
    %c0_4 = arith.constant 0 : index
    %c2 = arith.constant 2 : index
    %c0_5 = arith.constant 0 : index
    %4 = vector.load %arg1[%c0_4, %c2, %c0_5] : memref<2x18x72xbf16, #tpu.memory_space<vmem>>, vector<2x16x72xbf16>
    %5 = vector.shape_cast %4 : vector<2x16x72xbf16> to vector<32x72xbf16>
    %6 = tpu.concatenate %1, %3, %5 in 1 : vector<32x72xbf16>, vector<32x72xbf16>, vector<32x72xbf16> -> vector<32x216xbf16>
    %c0_6 = arith.constant 0 : index
    %c0_7 = arith.constant 0 : index
    %7 = vector.load %arg2[%c0_6, %c0_7] : memref<216x128xbf16, #tpu.memory_space<vmem>>, vector<216x128xbf16>
    %cst = arith.constant dense<0.000000e+00> : vector<32x128xf32>
    %8 = tpu.matmul %6, %7, %cst {dimension_numbers = #tpu.dot_dimension_numbers<[1], [0], [0], [1], [0, 0, 1, 1], [], []>} : vector<32x216xbf16>, vector<216x128xbf16>, vector<32x128xf32> -> vector<32x128xf32>
    %c0_8 = arith.constant 0 : index
    %c0_9 = arith.constant 0 : index
    %9 = vector.load %arg3[%c0_8, %c0_9] : memref<1x128xf32, #tpu.memory_space<vmem>>, vector<1x128xf32>
    %10 = vector.broadcast %9 : vector<1x128xf32> to vector<32x128xf32>
    %11 = arith.addf %8, %10 : vector<32x128xf32>
    %c0_10 = arith.constant 0 : index
    %12 = memref.load %arg4[%c0_10] : memref<1xf32, #tpu.memory_space<smem>>
    %cst_11 = arith.constant 0.000000e+00 : f32
    %13 = vector.broadcast %cst_11 : f32 to vector<32x128xf32>
    %14 = arith.cmpf oge, %11, %13 : vector<32x128xf32>
    %15 = vector.broadcast %12 : f32 to vector<32x128xf32>
    %16 = arith.mulf %15, %11 : vector<32x128xf32>
    %17 = arith.select %14, %11, %16 : vector<32x128xi1>, vector<32x128xf32>
    %18 = vector.shape_cast %17 : vector<32x128xf32> to vector<2x16x128xf32>
    %c0_12 = arith.constant 0 : index
    %c0_13 = arith.constant 0 : index
    %c0_14 = arith.constant 0 : index
    %19 = vector.load %arg5[%c0_12, %c0_13, %c0_14] : memref<2x16x128xf32, #tpu.memory_space<vmem>>, vector<2x16x128xf32>
    tpu.vector_store %arg5[%c0_12, %c0_13, %c0_14], %18 {strides = array<i32>} : memref<2x16x128xf32, #tpu.memory_space<vmem>>, vector<2x16x128xf32>,
    return
  }
  func.func @transform_0(%arg0: i32) -> (i32, i32, i32) {
    %c0_i32 = arith.constant 0 : i32
    %c0_i32_0 = arith.constant 0 : i32
    %c0_i32_1 = arith.constant 0 : i32
    return %arg0, %c0_i32, %c0_i32_0 : i32, i32, i32
  }
  func.func @transform_1(%arg0: i32) -> (i32, i32) {
    %c0_i32 = arith.constant 0 : i32
    %c0_i32_0 = arith.constant 0 : i32
    %c0_i32_1 = arith.constant 0 : i32
    return %c0_i32, %c0_i32_0 : i32, i32
  }
  func.func @transform_2(%arg0: i32) -> (i32, i32) {
    %c0_i32 = arith.constant 0 : i32
    %c0_i32_0 = arith.constant 0 : i32
    %c0_i32_1 = arith.constant 0 : i32
    return %c0_i32, %c0_i32_0 : i32, i32
  }
  func.func @transform_3(%arg0: i32) -> i32 {
    %c0_i32 = arith.constant 0 : i32
    %c0_i32_0 = arith.constant 0 : i32
    return %c0_i32 : i32
  }
  func.func @transform_4(%arg0: i32) -> (i32, i32, i32) {
    %c0_i32 = arith.constant 0 : i32
    %c0_i32_0 = arith.constant 0 : i32
    %c0_i32_1 = arith.constant 0 : i32
    return %arg0, %c0_i32, %c0_i32_0 : i32, i32, i32
  }
}

</mosaic_0001>

<bundles_post_ra>
// kernel: tpu_custom_call.1
= control target key start
LH: loop header
LB: loop body
LE: loop exit
PB: predicated region body
PF: predicated region fallthrough
CT: control target
= control target key end

     0   :  { %10 = vsyncpa [#allocation4], 0  ;;  %s640_s0 = inlined_call_operand.vmem [shape: bf16[2,18,72], index: 0, kind: input, shape index: {}]   ;;  %s641_s1 = inlined_call_operand.hbm [shape: bf16[216,128], index: 1, kind: input, shape index: {}]   ;;  %s642_s2 = inlined_call_operand.vmem [shape: f32[1,128], index: 2, kind: input, shape index: {}]   ;;  %s643_s3 = inlined_call_operand.<no memory space> [shape: f32[1], index: 3, kind: input, shape index: {}]   ;;  %s644_s4 = inlined_call_operand.hbm [shape: f32[2,16,128], index: 4, kind: output, shape index: {}]  }
   0x1   :  { %11 = vsyncpa [#allocation5], 0  ;;  %s488_s15 = smov [#allocation3]  }
   0x2   :  { %s19_s16 = sshll.u32 %s488_s15, 4  ;;  %s20_s16 = int_to_ptr.vmem [resolvable:$true] %s19_s16 }
   0x3   :  { %s452_s17 = scalar_lea.vmem %s20_s16, 1728  ;;  %p457_p1 = scmp.lt.s32.totalorder %s20_s16, %s20_s16 }
   0x4   :  { %p453_p0 = scmp.ne.s32.totalorder %s20_s16, %s452_s17  ;;  %p458_p2 = scmp.lt.s32.totalorder %s452_s17, %s452_s17 }
   0x6   :  { %p459_p3 = por %p458_p2, %p457_p1 }
   0x8   :  { %p460_p4 = pnand %p459_p3, %p453_p0 }
   0xa   :  { %463 = shalt.err (!%p460_p4)
}
   0xb   :  { %s489_s18 = smov 64   ;;  %s490_s19 = smov 4  }
   0xc   :  { %25 = dma.hbm_to_vmem [thread:$0]  %s641_s1, 1728, %s20_s16, [#allocation4], %s489_s18, %s489_s18, %s490_s19  }
   0xd   :  { %484 = dma.done.wait [#allocation4], 1728  }
   0xe   :  { %485 = vsyncadd [#allocation4], 4294965568  ;;  %v491_v0 = vmov 0   ;;  %vm99_vm0 = vcmask 1042432   ;;  %vm100_vm1 = vcmask 1046532   ;;  %v428_v30 = vld [vmem:[#allocation3 + $0x38] sm:$0xff]  }
   0xf   :  { %282 = vmatprep.subr.bf16.mxu0 %v491_v0  ;;  %391 = vmatprep.subr.bf16.mxu1 %v491_v0  ;;  %vm527_vm2 = vmor %vm99_vm0, %vm100_vm1  ;;  %vm40_vm3 = vsmask.f32 3328  ;;  %vm41_vm4 = vsmask.f32 7440  ;;  %v534_v2 = vld [vmem:[%s640_s0 + $0x4] sm:$0xf] }
  0x10   :  { %v38_v3 = vld [vmem:[%s640_s0 + $0x8] sm:$0x1]  ;;  %v91_v4 = vld [vmem:[%s640_s0] sm:$0xe]  ;;  %v104_v6 = vrot.slane %v534_v2, 5  ;;  %v53_v9 = vshll.u32 %v534_v2, 16  ;;  %vm578_vm5 = vmor %vm40_vm3, %vm41_vm4  ;;  %283 = vmatpush1.bf16.msra.mxu0 %v428_v30  ;;  %405 = vmatpush1.bf16.msra.mxu1 %v428_v30 }
  0x11   :  { %v366_v5 = vrot.slane %v91_v4, 9  ;;  %v107_v7 = vrot.slane %v38_v3, 5  ;;  %v546_v8 = vld [vmem:[%s640_s0] sm:$0xf]  ;;  %v57_v12 = vshrl.u32 %v534_v2, 16  ;;  %v63_v13 = vshll.u32 %v38_v3, 16  ;;  %284 = vmatprep.subr.bf16.mxu0 %v491_v0  ;;  %392 = vmatprep.subr.bf16.mxu1 %v491_v0 }
  0x12   :  { %v44_v10 = vshrl.u32 %v546_v8, 16  ;;  %v47_v11 = vshll.u32 %v546_v8, 16  ;;  %v555_v14 = vld [vmem:[%s640_s0 + $0x10] sm:$0xf]  ;;  %v106_v16 = vrot.slane %v104_v6, 4  ;;  %v55_v17 = vrot.slane %v53_v9, 5 }
  0x13   :  { %v105_v15 = vsel %vm527_vm2, %v366_v5, %v104_v6  ;;  %v39_v18 = vld [vmem:[%s640_s0 + $0x14] sm:$0x1]  ;;  %v92_v19 = vld [vmem:[%s640_s0 + $0xc] sm:$0xe]  ;;  %v368_v20 = vcombine.low %v546_v8, %v534_v2  ;;  %v59_v23 = vrot.slane %v57_v12, 4  ;;  %v65_v24 = vrot.slane %v63_v13, 5 }
  0x14   :  { %v46_v21 = vrot.slane %v44_v10, 4  ;;  %v49_v22 = vrot.slane %v47_v11, 5  ;;  %v570_v25 = vld [vmem:[%s640_s0 + $0xc] sm:$0xf]  ;;  %v108_v26 = vsel %vm527_vm2, %v106_v16, %v107_v7  ;;  %v367_v27 = vrot.slane %v92_v19, 9  ;;  %v429_v40 = vld [vmem:[#allocation3 + $0x30] sm:$0xff]  }
  0x15   :  { %v111_v28 = vrot.slane %v555_v14, 5  ;;  %v114_v29 = vrot.slane %v39_v18, 5  ;;  %v372_v31 = vcombine.low %v105_v15, %v108_v26  ;;  %v60_v33 = vor.u32 %v59_v23, %v55_v17  ;;  %s492_s0 = smov 16   ;;  %285 = vmatpush1.bf16.msra.mxu0 %v429_v40  ;;  %406 = vmatpush1.bf16.msra.mxu1 %v429_v40  ;;  %v430_v56 = vld [vmem:[#allocation3 + $0x28] sm:$0xff]   ;;  %s493_s11 = smov 72   ;;  %v431_v62 = vld [vmem:[#allocation3 + $0x20] sm:$0xff]  }
  0x16   :  { %v50_v32 = vor.u32 %v49_v22, %v46_v21  ;;  %v68_v34 = vshrl.u32 %v570_v25, 16  ;;  %v71_v38 = vshll.u32 %v570_v25, 16  ;;  %v77_v39 = vshll.u32 %v555_v14, 16  ;;  %286 = vmatprep.subr.bf16.mxu0 %v491_v0  ;;  %393 = vmatprep.subr.bf16.mxu1 %v491_v0  ;;  %v432_v3 = vld [vmem:[#allocation3 + $0x18] sm:$0xff]   ;;  %v433_v4 = vld [vmem:[#allocation3 + $0x10] sm:$0xff]   ;;  %v434_v5 = vld [vmem:[#allocation3 + $0x8] sm:$0xff]  }
  0x17   :  { %v112_v36 = vsel %vm527_vm2, %v367_v27, %v111_v28  ;;  %v113_v37 = vrot.slane %v111_v28, 4  ;;  %140 = vrot.lane.b32.xlu1 %v372_v31, %s492_s0  ;;  %v61_v42 = vrot.slane %v60_v33, 4  ;;  %v81_v44 = vshrl.u32 %v555_v14, 16  ;;  %v435_v6 = vld [vmem:[#allocation3] sm:$0xff]   ;;  %v436_v7 = vld [vmem:[#allocation3 + $0x68] ss:$0 sps:$4 sm:$0xff]  }
  0x18   :  { %v51_v41 = vrot.slane %v50_v32, 4  ;;  %v70_v43 = vrot.slane %v68_v34, 4  ;;  %v73_v46 = vrot.slane %v71_v38, 5  ;;  %v79_v47 = vrot.slane %v77_v39, 5  ;;  %v437_v10 = vld [vmem:[#allocation3 + $0x60] sm:$0xff]   ;;  %v438_v11 = vld [vmem:[#allocation3 + $0x58] sm:$0xff]  }
  0x19   :  { %v115_v45 = vsel %vm527_vm2, %v113_v37, %v114_v29  ;;  %v87_v48 = vshll.u32 %v39_v18, 16  ;;  %v66_v50 = vsel %vm578_vm5, %v61_v42, %v65_v24  ;;  %v83_v52 = vrot.slane %v81_v44, 4  ;;  %287 = vmatpush1.bf16.msra.mxu0 %v430_v56  ;;  %407 = vmatpush1.bf16.msra.mxu1 %v430_v56  ;;  %v439_v12 = vld [vmem:[#allocation3 + $0x50] sm:$0xff]   ;;  %v440_v13 = vld [vmem:[#allocation3 + $0x48] sm:$0xff]   ;;  %v441_v15 = vld [vmem:[#allocation3 + $0x40] sm:$0xff]  }
  0x1a   :  { %v56_v49 = vsel %vm578_vm5, %v51_v41, %v55_v17  ;;  %v373_v51 = vcombine.low %v112_v36, %v115_v45  ;;  %v74_v54 = vor.u32 %v73_v46, %v70_v43  ;;  %v369_v57 = vcombine.low %v570_v25, %v555_v14  ;;  %288 = vmatprep.subr.bf16.mxu0 %v491_v0  ;;  %v374_v24 = vld [vmem:[%s642_s2] ss:$0 sm:$0xff]  ;;  %s494_s2 = smov [#allocation6]  }
  0x1b   :  { %v370_v53 = vcombine.low %v56_v49, %v66_v50  ;;  %v89_v55 = vrot.slane %v87_v48, 5  ;;  %v84_v58 = vor.u32 %v83_v52, %v79_v47  ;;  %394 = vmatprep.subr.bf16.mxu1 %v491_v0  ;;  %vm278_vm6 = vcmask 1043456  }
  0x1c   :  { %142 = vrot.lane.b32.xlu1 %v373_v51, %s492_s0  ;;  %v75_v59 = vrot.slane %v74_v54, 4  ;;  %v280_v9 = vsel %vm278_vm6, %v436_v7, 0  ;;  %vm153_vm7 = vcmask 130048   ;;  %vm144_vm8 = vcmask 588800  }
  0x1d   :  { %130 = vrot.lane.b32.xlu0 %v370_v53, %s493_s11  ;;  %v85_v60 = vrot.slane %v84_v58, 4  ;;  %289 = vmatpush1.bf16.msra.mxu0 %v431_v62  ;;  %vm273_vm9 = vcmask 719872   ;;  %v336_v2 = vstv %s643_s3  ;;  %s354_s3 = sshll.u32 %s494_s2, 4  ;;  %s355_s3 = int_to_ptr.vmem [resolvable:$true] %s354_s3 }
  0x1e   :  { %v80_v61 = vsel %vm578_vm5, %v75_v59, %v79_v47  ;;  %290 = vmatprep.subr.bf16.mxu0 %v491_v0  ;;  %408 = vmatpush1.bf16.msra.mxu1 %v431_v62  ;;  %s464_s16 = scalar_lea.vmem %s355_s3, 512  ;;  %p469_p6 = scmp.lt.s32.totalorder %s355_s3, %s355_s3 }
  0x1f   :  { %v90_v63 = vsel %vm578_vm5, %v85_v60, %v89_v55  ;;  %395 = vmatprep.subr.bf16.mxu1 %v491_v0  ;;  %p465_p5 = scmp.ne.s32.totalorder %s355_s3, %s464_s16  ;;  %p470_p7 = scmp.lt.s32.totalorder %s464_s16, %s464_s16 }
  0x20   :  { %v371_v1 = vcombine.low %v80_v61, %v90_v63 }
  0x21   :  { %291 = vmatpush1.bf16.msra.mxu0 %v432_v3  ;;  %p471_p8 = por %p470_p7, %p469_p6 }
  0x22   :  { %132 = vrot.lane.b32.xlu0 %v371_v1, %s493_s11  ;;  %292 = vmatprep.subr.bf16.mxu0 %v491_v0 }
  0x23   :  { %409 = vmatpush1.bf16.msra.mxu1 %v432_v3  ;;  %p472_p9 = pnand %p471_p8, %p465_p5 }
  0x24   :  { %396 = vmatprep.subr.bf16.mxu1 %v491_v0 }
  0x25   :  { %293 = vmatpush1.bf16.msra.mxu0 %v433_v4 }
  0x26   :  { %294 = vmatprep.subr.bf16.mxu0 %v491_v0 }
  0x27   :  { %410 = vmatpush1.bf16.msra.mxu1 %v433_v4 }
  0x28   :  { %397 = vmatprep.subr.bf16.mxu1 %v491_v0 }
  0x29   :  { %295 = vmatpush1.bf16.msra.mxu0 %v434_v5 }
  0x2a   :  { %296 = vmatprep.subr.bf16.mxu0 %v491_v0 }
  0x2b   :  { %411 = vmatpush1.bf16.msra.mxu1 %v434_v5 }
  0x2c   :  { %398 = vmatprep.subr.bf16.mxu1 %v491_v0 }
  0x2d   :  { %297 = vmatpush1.bf16.msra.mxu0 %v435_v6 }
  0x2e   :  { %302 = vmatprep.subr.bf16.mxu0 %v491_v0 }
  0x2f   :  { %412 = vmatpush1.bf16.msra.mxu1 %v435_v6 }
  0x30   :  { %399 = vmatprep.subr.bf16.mxu1 %v491_v0 }
  0x31   :  { %303 = vmatpush2.bf16.msra.mxu0 %v280_v9 }
  0x32   :  { %304 = vmatprep.subr.bf16.mxu0 %v491_v0 }
  0x33   :  { %413 = vmatpush2.bf16.msra.mxu1 %v280_v9 }
  0x34   :  { %400 = vmatprep.subr.bf16.mxu1 %v491_v0 }
  0x35   :  { %305 = vmatpush2.bf16.msra.mxu0 %v437_v10 }
  0x36   :  { %306 = vmatprep.subr.bf16.mxu0 %v491_v0 }
  0x37   :  { %414 = vmatpush2.bf16.msra.mxu1 %v437_v10 }
  0x38   :  { %401 = vmatprep.subr.bf16.mxu1 %v491_v0 }
  0x39   :  { %307 = vmatpush2.bf16.msra.mxu0 %v438_v11 }
  0x3a   :  { %308 = vmatprep.subr.bf16.mxu0 %v491_v0 }
  0x3b   :  { %415 = vmatpush2.bf16.msra.mxu1 %v438_v11 }
  0x3c   :  { %402 = vmatprep.subr.bf16.mxu1 %v491_v0 }
  0x3d   :  { %309 = vmatpush2.bf16.msra.mxu0 %v439_v12 }
  0x3e   :  { %310 = vmatprep.subr.bf16.mxu0 %v491_v0 }
  0x3f   :  { %416 = vmatpush2.bf16.msra.mxu1 %v439_v12 }
  0x40   :  { %403 = vmatprep.subr.bf16.mxu1 %v491_v0 }
  0x41   :  { %311 = vmatpush2.bf16.msra.mxu0 %v440_v13 }
  0x42   :  { %312 = vmatprep.subr.bf16.mxu0 %v491_v0 }
  0x43   :  { %417 = vmatpush2.bf16.msra.mxu1 %v440_v13 }
  0x44   :  { %404 = vmatprep.subr.bf16.mxu1 %v491_v0 }
  0x45   :  { %313 = vmatpush2.bf16.msra.mxu0 %v441_v15 }
  0x47   :  { %418 = vmatpush2.bf16.msra.mxu1 %v441_v15 }
  0x89   :  { %v141_v16 = vpop.permute.xlu1 %140 }
  0x8e   :  { %v143_v21 = vpop.permute.xlu1 %142 }
  0x8f   :  { %v131_v17 = vpop.permute.xlu0 %130 }
  0x90   :  { %v155_v18 = vsel %vm153_vm7, %v131_v17, %v141_v16  ;;  %v147_v19 = vsel %vm144_vm8, %v368_v20, %v131_v17 }
  0x91   :  { %389 = vmatprep.mubr.msk.bf16.mxu0 %vm273_vm9, %v155_v18 }
  0x92   :  { %315 = vmatmul.mubr.bf16.vlgmr.msra.gmra.mxu0 %v147_v19 }
  0x94   :  { %v133_v22 = vpop.permute.xlu0 %132 }
  0x95   :  { %v157_v23 = vsel %vm153_vm7, %v133_v22, %v143_v21  ;;  %v151_v0 = vsel %vm144_vm8, %v369_v57, %v133_v22 }
  0x96   :  { %390 = vmatprep.mubr.msk.bf16.mxu1 %vm273_vm9, %v157_v23 }
  0x97   :  { %323 = vmatmul.mubr.bf16.vlgmr.msra.gmra.mxu1 %v151_v0 }
 0x152   :  { %v316_v26 = vpop.f32.mrf.mxu0 }
 0x153   :  { %v317_v8 = vadd.f32 %v374_v24, %v316_v26 }
 0x154   :  { %v318_v20 = vpop.f32.mrf.mxu0 }
 0x155   :  { %vm332_vm10 = vcmp.ge.f32.partialorder %v317_v8, 0.0  ;;  %v337_v27 = vmul.f32 %v336_v2, %v317_v8 }
 0x156   :  { %v319_v28 = vpop.f32.mrf.mxu0 }
 0x157   :  { %v341_v29 = vsel %vm332_vm10, %v317_v8, %v337_v27  ;;  %v320_v30 = vadd.f32 %v374_v24, %v319_v28  ;;  %v324_v14 = vpop.f32.mrf.mxu1 }
 0x158   :  { %345 = vst [vmem:[#allocation6] sm:$0xff] %v341_v29  ;;  %v321_v25 = vpop.f32.mrf.mxu0  ;;  %v325_v32 = vadd.f32 %v374_v24, %v324_v14 }
 0x159   :  { %vm333_vm11 = vcmp.ge.f32.partialorder %v320_v30, 0.0  ;;  %v338_v31 = vmul.f32 %v336_v2, %v320_v30  ;;  %v326_v33 = vpop.f32.mrf.mxu1 }
 0x15a   :  { %vm334_vm12 = vcmp.ge.f32.partialorder %v325_v32, 0.0  ;;  %v339_v35 = vmul.f32 %v336_v2, %v325_v32 }
 0x15b   :  { %v342_v34 = vsel %vm333_vm11, %v320_v30, %v338_v31  ;;  %v327_v36 = vpop.f32.mrf.mxu1 }
 0x15c   :  { %346 = vst [vmem:[#allocation6 + $0x8] sm:$0xff] %v342_v34  ;;  %v343_v37 = vsel %vm334_vm12, %v325_v32, %v339_v35  ;;  %v328_v38 = vadd.f32 %v374_v24, %v327_v36 }
 0x15d   :  { %347 = vst [vmem:[#allocation6 + $0x10] sm:$0xff] %v343_v37  ;;  %v329_v39 = vpop.f32.mrf.mxu1 }
 0x15e   :  { %vm335_vm13 = vcmp.ge.f32.partialorder %v328_v38, 0.0  ;;  %v340_v40 = vmul.f32 %v336_v2, %v328_v38 }
 0x160   :  { %v344_v41 = vsel %vm335_vm13, %v328_v38, %v340_v40 }
 0x161   :  { %348 = vst [vmem:[#allocation6 + $0x18] sm:$0xff] %v344_v41 }
 0x162   :  { %475 = shalt.err (!%p472_p9)
}
 0x163   :  { %s495_s17 = smov 128   ;;  %s496_s18 = smov 8  }
 0x164   :  { %360 = dma.vmem_to_hbm [thread:$0]  %s355_s3, 512, %s644_s4, [#allocation5], %s495_s17, %s495_s17, %s496_s18  }
 0x165   :  { %486 = dma.done.wait [#allocation5], 512  }
 0x166   :  { %487 = vsyncadd [#allocation5], 4294966784 }
 0x167   :  { %364 = vsyncpa [#allocation4], 1 }
 0x168   :  { %365 = vsyncpa [#allocation5], 1 }

</bundles_post_ra>
